<compile_context>
chip_gen: v7x
topology: tpu7x:2x2x1
jax: 0.10.0
libtpu: 0.0.40
codegen_flags: <defaults>
</compile_context>

<pallas_src>
import functools
import math

import jax
import jax.numpy as jnp
from jax import lax
from jax.experimental import pallas as pl
from jax.experimental.pallas import tpu as pltpu


_MXU_DTYPE = jnp.bfloat16  # MXU operand dtype; accumulation stays f32.


# ------------------------------ small helpers -------------------------------

def _pick_div_tile(dim, candidates):
    """Largest candidate that exactly divides `dim`, else the full dim."""
    for c in candidates:
        if dim >= c and dim % c == 0:
            return c
    return dim


def _vmem_limit(block_bytes):
    """Scoped-VMEM limit with headroom; stays below v7x's 64 MiB physical VMEM."""
    return int(min(max(2 * block_bytes, 16 * 1024 * 1024), 60 * 1024 * 1024))


# ----------------------------- linear kernels ------------------------------

def _linear_kernel(x_ref, w_ref, o_ref, acc_ref):
    @pl.when(pl.program_id(2) == 0)
    def _():
        acc_ref[...] = jnp.zeros_like(acc_ref)

    acc_ref[...] += jnp.dot(x_ref[...].astype(_MXU_DTYPE),
                            w_ref[...].astype(_MXU_DTYPE),
                            preferred_element_type=jnp.float32)

    @pl.when(pl.program_id(2) == pl.num_programs(2) - 1)
    def _():
        o_ref[...] = acc_ref[...].astype(o_ref.dtype)


def _linear_bias_kernel(x_ref, w_ref, b_ref, o_ref, acc_ref):
    @pl.when(pl.program_id(2) == 0)
    def _():
        acc_ref[...] = jnp.zeros_like(acc_ref)

    acc_ref[...] += jnp.dot(x_ref[...].astype(_MXU_DTYPE),
                            w_ref[...].astype(_MXU_DTYPE),
                            preferred_element_type=jnp.float32)

    @pl.when(pl.program_id(2) == pl.num_programs(2) - 1)
    def _():
        o_ref[...] = (acc_ref[...] + b_ref[...]).astype(o_ref.dtype)


def pallas_linear(x2d, w, b=None, *, row_tile=256):
    """y = x2d @ w (+ b).  x2d: (M, K), w: (K, Nout), b: (Nout,) or None."""
    M, K = x2d.shape
    _, Nout = w.shape

    tm = row_tile if M > row_tile else M                    # ragged last block via cdiv
    tn = _pick_div_tile(Nout, (512, 256, 128))              # column (lane) tile
    tk = _pick_div_tile(K, (512, 256, 128)) if K > 512 else K  # only exact K tiles

    grid = (pl.cdiv(M, tm), pl.cdiv(Nout, tn), pl.cdiv(K, tk))

    in_specs = [pl.BlockSpec((tm, tk), lambda i, j, k: (i, k)),
                pl.BlockSpec((tk, tn), lambda i, j, k: (k, j))]
    args = [x2d, w]
    if b is not None:
        in_specs.append(pl.BlockSpec((1, tn), lambda i, j, k: (0, j)))
        args.append(b.reshape(1, Nout))
        kernel = _linear_bias_kernel
    else:
        kernel = _linear_kernel

    # Rough per-step VMEM footprint: double-buffered in/out blocks + accumulator.
    block_bytes = 4 * (2 * tm * tk + 2 * tk * tn + 2 * tm * tn + tm * tn + tn)
    cost = pl.CostEstimate(
        flops=2 * M * K * Nout,
        transcendentals=0,
        bytes_accessed=4 * (M * K * grid[1] + K * Nout * grid[0] + M * Nout + Nout))

    return pl.pallas_call(
        kernel,
        out_shape=jax.ShapeDtypeStruct((M, Nout), x2d.dtype),
        grid=grid,
        in_specs=in_specs,
        out_specs=pl.BlockSpec((tm, tn), lambda i, j, k: (i, j)),
        scratch_shapes=[pltpu.VMEM((tm, tn), jnp.float32)],
        compiler_params=pltpu.CompilerParams(
            dimension_semantics=("parallel", "parallel", "arbitrary"),
            vmem_limit_bytes=_vmem_limit(block_bytes)),
        cost_estimate=cost,
    )(*args)


# --------------------------- attention core kernel --------------------------

def _attn_core_kernel(*refs, scale, eps, has_mask, mask_is_bool):
    if has_mask:
        q_ref, k_ref, v_ref, m_ref, qw_ref, kw_ref, o_ref = refs
    else:
        q_ref, k_ref, v_ref, qw_ref, kw_ref, o_ref = refs

    q = q_ref[...].astype(jnp.float32)        # (tq, D)
    k = k_ref[...].astype(jnp.float32)        # (N,  D)

    # RMSNorm over the head dim in f32 (matches RMSNorm(head_dim, eps)).
    qn = q * lax.rsqrt(jnp.mean(q * q, axis=-1, keepdims=True) + eps) * qw_ref[...]
    kn = k * lax.rsqrt(jnp.mean(k * k, axis=-1, keepdims=True) + eps) * kw_ref[...]

    # scores = qn @ kn^T * scale — bf16 MXU operands, f32 accumulation.
    s = lax.dot_general(qn.astype(_MXU_DTYPE), kn.astype(_MXU_DTYPE),
                        (((1,), (1,)), ((), ())),
                        preferred_element_type=jnp.float32) * scale     # (tq, N)

    if has_mask:
        if mask_is_bool:
            # SDPA bool-mask semantics: True = attend, False = masked.
            # (Fully-masked rows give a uniform row instead of PyTorch's NaN.)
            s = jnp.where(m_ref[...] != 0, s, -1e30)
        else:
            s = s + m_ref[...].astype(jnp.float32)

    # Numerically stable softmax with deferred normalisation.
    s = s - jnp.max(s, axis=-1, keepdims=True)
    p = jnp.exp(s)                                                       # (tq, N)
    row_sum = jnp.sum(p, axis=-1, keepdims=True)

    o = jnp.dot(p.astype(_MXU_DTYPE), v_ref[...].astype(_MXU_DTYPE),
                preferred_element_type=jnp.float32)                      # (tq, D)
    o_ref[...] = (o * pl.reciprocal(row_sum, approx=True)).astype(o_ref.dtype)


def pallas_attention_core(q, k, v, q_norm_w, k_norm_w, scale, eps,
                          mask=None, mask_is_bool=False, mask_shared=False):
    """q, k, v: (B, H, N, D) -> attention output (B, H, N, D)."""
    B, H, N, D = q.shape
    has_mask = mask is not None

    # Query tile: cap live (tq, N) scores; full tile when N is small.
    if N <= 256:
        tq = N
    else:
        tq = _pick_div_tile(N, (256, 128))
        if tq == N:          # N has no clean divisor: ragged last block via cdiv
            tq = 128
    nq = pl.cdiv(N, tq)

    kernel = functools.partial(_attn_core_kernel, scale=scale, eps=eps,
                               has_mask=has_mask, mask_is_bool=mask_is_bool)

    q_spec = pl.BlockSpec((None, None, tq, D), lambda b, h, i: (b, h, i, 0))
    kv_spec = pl.BlockSpec((None, None, N, D), lambda b, h, i: (b, h, 0, 0))
    w_spec = pl.BlockSpec((1, D), lambda b, h, i: (0, 0))

    in_specs = [q_spec, kv_spec, kv_spec]
    args = [q, k, v]
    if has_mask:
        if mask_shared:
            # Single (N, N) mask shared across (B, H): index_map ignores b/h.
            in_specs.append(pl.BlockSpec((tq, N), lambda b, h, i: (i, 0)))
        else:
            in_specs.append(pl.BlockSpec((None, None, tq, N),
                                         lambda b, h, i: (b, h, i, 0)))
        args.append(mask)
    in_specs += [w_spec, w_spec]
    args += [q_norm_w.reshape(1, D), k_norm_w.reshape(1, D)]

    # Advisory cost estimate (k/v are re-read once per q tile; bool mask = 1 B).
    mask_bytes = ((1 if mask_is_bool else 4) * B * H * N * N) if has_mask else 0
    cost = pl.CostEstimate(
        flops=4 * B * H * N * N * D + 12 * B * H * N * D,
        transcendentals=B * H * N * N + 2 * B * H * N,
        bytes_accessed=(4 * 2 * B * H * N * D            # q in + o out
                        + 4 * 2 * B * H * nq * N * D     # k, v re-reads
                        + mask_bytes))

    # Per-step VMEM footprint: double-buffered q/k/v/out/mask blocks + score temps.
    mask_blk = (tq * N * (1 if mask_is_bool else 4)) if has_mask else 0
    block_bytes = (2 * 4 * (tq * D + 2 * N * D + tq * D)
                   + 2 * mask_blk + 3 * 4 * tq * N)

    return pl.pallas_call(
        kernel,
        out_shape=jax.ShapeDtypeStruct((B, H, N, D), q.dtype),
        grid=(B, H, nq),
        in_specs=in_specs,
        out_specs=pl.BlockSpec((None, None, tq, D), lambda b, h, i: (b, h, i, 0)),
        compiler_params=pltpu.CompilerParams(
            dimension_semantics=("parallel", "parallel", "parallel"),
            vmem_limit_bytes=_vmem_limit(block_bytes)),
        cost_estimate=cost,
    )(*args)


# ------------------------------- module port --------------------------------

def _prepare_mask(attn_mask, B, H, N):
    """SDPA mask -> (array, is_bool, shared-over-(B,H))."""
    m = jnp.asarray(attn_mask)
    is_bool = (m.dtype == jnp.bool_)
    shared = (m.ndim == 2 and m.shape == (N, N))
    if not shared:
        # TODO(synk): broadcastable non-(N,N) masks are materialised per (B,H).
        m = jnp.broadcast_to(m, (B, H, N, N))
    if is_bool:
        m = m.astype(jnp.int8)     # 1-byte mask; additive bias built in-kernel
    else:
        m = m.astype(jnp.float32)
    return m, is_bool, shared


class Attention:
    """JAX/Pallas port of the PyTorch Attention forward pass."""

    def __init__(self, dim, num_heads=8, qkv_bias=False, key=None):
        assert dim % num_heads == 0, "dim should be divisible by num_heads"
        self.dim = dim
        self.num_heads = num_heads
        self.head_dim = dim // num_heads
        self.scale = self.head_dim ** (-0.5)
        self.eps = 1e-5

        k1, k2, k3, k4 = jax.random.split(key, 4)
        lim = 1.0 / math.sqrt(dim)  # nn.Linear default init U(-1/sqrt(in), 1/sqrt(in))
        # Weights stored already transposed: y = x @ W (+ b).
        self.w_qkv = jax.random.uniform(k1, (dim, 3 * dim), jnp.float32, -lim, lim)
        self.b_qkv = (jax.random.uniform(k2, (3 * dim,), jnp.float32, -lim, lim)
                      if qkv_bias else None)
        self.w_proj = jax.random.uniform(k3, (dim, dim), jnp.float32, -lim, lim)
        self.b_proj = jax.random.uniform(k4, (dim,), jnp.float32, -lim, lim)
        # RMSNorm weights init to ones.
        self.q_norm_w = jnp.ones((self.head_dim,), jnp.float32)
        self.k_norm_w = jnp.ones((self.head_dim,), jnp.float32)

    def __call__(self, x, attn_mask=None):
        B, N, C = x.shape
        H, D = self.num_heads, self.head_dim

        # Fused QKV projection (tiled Pallas matmul).
        qkv = pallas_linear(x.reshape(B * N, C), self.w_qkv, self.b_qkv)  # (B*N, 3C)

        # Layout plumbing: (B, N, 3, H, D) -> (3, B, H, N, D).
        qkv = qkv.reshape(B, N, 3, H, D).transpose(2, 0, 3, 1, 4)
        q, k, v = qkv[0], qkv[1], qkv[2]

        mask = None
        mask_is_bool = False
        mask_shared = False
        if attn_mask is not None:
            mask, mask_is_bool, mask_shared = _prepare_mask(attn_mask, B, H, N)
        # TODO(synk): flex_attention BlockMask (block-sparse) path not implemented.

        o = pallas_attention_core(q, k, v, self.q_norm_w, self.k_norm_w,
                                  self.scale, self.eps, mask,
                                  mask_is_bool, mask_shared)               # (B, H, N, D)

        o = o.transpose(0, 2, 1, 3).reshape(B * N, C)
        out = pallas_linear(o, self.w_proj, self.b_proj)
        return out.reshape(B, N, C)


# ------------------------------- reference ----------------------------------

def _reference(mod, x, attn_mask=None):
    B, N, C = x.shape
    H, D = mod.num_heads, mod.head_dim
    hp = jax.lax.Precision.HIGHEST

    qkv = jnp.dot(x.reshape(B * N, C), mod.w_qkv, precision=hp)
    if mod.b_qkv is not None:
        qkv = qkv + mod.b_qkv
    qkv = qkv.reshape(B, N, 3, H, D).transpose(2, 0, 3, 1, 4)
    q, k, v = qkv[0], qkv[1], qkv[2]

    def rms(t, w):
        return t * lax.rsqrt(jnp.mean(t * t, -1, keepdims=True) + mod.eps) * w

    q = rms(q, mod.q_norm_w)
    k = rms(k, mod.k_norm_w)
    s = jnp.einsum("bhqd,bhkd->bhqk", q, k, precision=hp) * mod.scale
    if attn_mask is not None:
        m = jnp.asarray(attn_mask)
        if m.dtype == jnp.bool_:
            bias = jnp.where(m, 0.0, -1e30).astype(jnp.float32)
        else:
            bias = m.astype(jnp.float32)
        s = s + jnp.broadcast_to(bias, s.shape)
    p = jax.nn.softmax(s, axis=-1)
    o = jnp.einsum("bhqk,bhkd->bhqd", p, v, precision=hp)
    o = o.transpose(0, 2, 1, 3).reshape(B * N, C)
    out = jnp.dot(o, mod.w_proj, precision=hp) + mod.b_proj
    return out.reshape(B, N, C)


# --------------------------------- main --------------------------------------

if __name__ == "__main__":
    dim, num_heads = 32, 4          # head_dim = 8
    B, N = 2, 8

    key = jax.random.PRNGKey(0)
    k_params, k_x, k_m = jax.random.split(key, 3)
    mod = Attention(dim, num_heads=num_heads, qkv_bias=False, key=k_params)
    x = jax.random.normal(k_x, (B, N, dim), jnp.float32)

    # Tolerances are loosened vs. the f32 HIGHEST reference because the MXU
    # matmuls deliberately use bf16 operands (f32 accumulation).
    ATOL = RTOL = 3e-2

    # 1) attn_mask=None path.
    out = jax.block_until_ready(mod(x))
    ref = _reference(mod, x)
    assert out.shape == (B, N, dim) and out.dtype == jnp.float32
    assert jnp.allclose(out, ref, atol=ATOL, rtol=RTOL), "mismatch (mask=None)"

    # 2) dense boolean attn_mask path (shared (N, N) causal mask, int8 in-kernel).
    causal = jnp.tril(jnp.ones((N, N), dtype=bool))
    out_m = jax.block_until_ready(mod(x, attn_mask=causal))
    ref_m = _reference(mod, x, attn_mask=causal)
    assert jnp.allclose(out_m, ref_m, atol=ATOL, rtol=RTOL), "mismatch (bool mask)"

    # 3) additive float mask path (per-batch bias, broadcast to (B, H, N, N)).
    fmask = 0.1 * jax.random.normal(k_m, (B, 1, N, N), jnp.float32)
    out_f = jax.block_until_ready(mod(x, attn_mask=fmask))
    ref_f = _reference(mod, x, attn_mask=fmask)
    assert jnp.allclose(out_f, ref_f, atol=ATOL, rtol=RTOL), "mismatch (float mask)"

    print("KERNEL_OK")
</pallas_src>

<mosaic_0001>
module attributes {stable_mosaic.version = 11 : i64} {
  func.func @_linear_kernel(%arg0: i32, %arg1: i32, %arg2: i32, %arg3: memref<16x32xf32, #tpu.memory_space<vmem>>, %arg4: memref<32x96xf32, #tpu.memory_space<vmem>>, %arg5: memref<16x96xf32, #tpu.memory_space<vmem>>, %arg6: memref<16x96xf32, #tpu.memory_space<vmem>>) attributes {dimension_semantics = [#tpu.dimension_semantics<parallel>, #tpu.dimension_semantics<parallel>, #tpu.dimension_semantics<arbitrary>], iteration_bounds = array<i64: 1, 1, 1>, scalar_prefetch = 0 : i64, scratch_operands = 1 : i64, tpu.core_type = #tpu.core_type<tc>, window_params = [{transform_indices = @transform_0, window_bounds = array<i64: 16, 32>}, {transform_indices = @transform_1, window_bounds = array<i64: 32, 96>}, {transform_indices = @transform_2, window_bounds = array<i64: 16, 96>}]} {
    %c0_i32 = arith.constant 0 : i32
    %0 = arith.cmpi eq, %arg2, %c0_i32 : i32
    %1 = arith.extui %0 : i1 to i32
    %c0_i32_0 = arith.constant 0 : i32
    %2 = arith.cmpi ne, %1, %c0_i32_0 : i32
    scf.if %2 {
      %cst_10 = arith.constant 0.000000e+00 : f32
      %14 = vector.broadcast %cst_10 : f32 to vector<16x96xf32>
      %c0_11 = arith.constant 0 : index
      %c0_12 = arith.constant 0 : index
      %15 = vector.load %arg6[%c0_11, %c0_12] : memref<16x96xf32, #tpu.memory_space<vmem>>, vector<16x96xf32>
      tpu.vector_store %arg6[%c0_11, %c0_12], %14 {strides = array<i32>} : memref<16x96xf32, #tpu.memory_space<vmem>>, vector<16x96xf32>,
    } else {
    }
    %c0 = arith.constant 0 : index
    %c0_1 = arith.constant 0 : index
    %3 = vector.load %arg6[%c0, %c0_1] : memref<16x96xf32, #tpu.memory_space<vmem>>, vector<16x96xf32>
    %c0_2 = arith.constant 0 : index
    %c0_3 = arith.constant 0 : index
    %4 = vector.load %arg3[%c0_2, %c0_3] : memref<16x32xf32, #tpu.memory_space<vmem>>, vector<16x32xf32>
    %5 = arith.truncf %4 : vector<16x32xf32> to vector<16x32xbf16>
    %c0_4 = arith.constant 0 : index
    %c0_5 = arith.constant 0 : index
    %6 = vector.load %arg4[%c0_4, %c0_5] : memref<32x96xf32, #tpu.memory_space<vmem>>, vector<32x96xf32>
    %7 = arith.truncf %6 : vector<32x96xf32> to vector<32x96xbf16>
    %cst = arith.constant dense<0.000000e+00> : vector<16x96xf32>
    %8 = tpu.matmul %5, %7, %cst {dimension_numbers = #tpu.dot_dimension_numbers<[1], [0], [0], [1], [0, 0, 1, 1], [], []>} : vector<16x32xbf16>, vector<32x96xbf16>, vector<16x96xf32> -> vector<16x96xf32>
    %9 = arith.addf %3, %8 : vector<16x96xf32>
    %c0_6 = arith.constant 0 : index
    %c0_7 = arith.constant 0 : index
    %10 = vector.load %arg6[%c0_6, %c0_7] : memref<16x96xf32, #tpu.memory_space<vmem>>, vector<16x96xf32>
    tpu.vector_store %arg6[%c0_6, %c0_7], %9 {strides = array<i32>} : memref<16x96xf32, #tpu.memory_space<vmem>>, vector<16x96xf32>,
    %c0_i32_8 = arith.constant 0 : i32
    %11 = arith.cmpi eq, %arg2, %c0_i32_8 : i32
    %12 = arith.extui %11 : i1 to i32
    %c0_i32_9 = arith.constant 0 : i32
    %13 = arith.cmpi ne, %12, %c0_i32_9 : i32
    scf.if %13 {
      %c0_10 = arith.constant 0 : index
      %c0_11 = arith.constant 0 : index
      %14 = vector.load %arg6[%c0_10, %c0_11] : memref<16x96xf32, #tpu.memory_space<vmem>>, vector<16x96xf32>
      %c0_12 = arith.constant 0 : index
      %c0_13 = arith.constant 0 : index
      %15 = vector.load %arg5[%c0_12, %c0_13] : memref<16x96xf32, #tpu.memory_space<vmem>>, vector<16x96xf32>
      tpu.vector_store %arg5[%c0_12, %c0_13], %14 {strides = array<i32>} : memref<16x96xf32, #tpu.memory_space<vmem>>, vector<16x96xf32>,
    } else {
    }
    return
  }
  func.func @transform_0(%arg0: i32, %arg1: i32, %arg2: i32) -> (i32, i32) {
    %c0_i32 = arith.constant 0 : i32
    return %arg0, %arg2 : i32, i32
  }
  func.func @transform_1(%arg0: i32, %arg1: i32, %arg2: i32) -> (i32, i32) {
    %c0_i32 = arith.constant 0 : i32
    return %arg2, %arg1 : i32, i32
  }
  func.func @transform_2(%arg0: i32, %arg1: i32, %arg2: i32) -> (i32, i32) {
    %c0_i32 = arith.constant 0 : i32
    return %arg0, %arg1 : i32, i32
  }
}

</mosaic_0001>

<bundles_post_ra>
// kernel: tpu_custom_call.1
= control target key start
LH: loop header
LB: loop body
LE: loop exit
PB: predicated region body
PF: predicated region fallthrough
CT: control target
= control target key end

     0   :  { %7 = vsyncpa [#allocation4], 0  ;;  %s298_s0 = inlined_call_operand.hbm [shape: f32[16,32], index: 0, kind: input, shape index: {}]   ;;  %s299_s1 = inlined_call_operand.hbm [shape: f32[32,96], index: 1, kind: input, shape index: {}]   ;;  %s300_s2 = inlined_call_operand.hbm [shape: f32[16,96], index: 2, kind: output, shape index: {}]  }
   0x1   :  { %8 = vsyncpa [#allocation7], 0 }
   0x2   :  { %9 = vsyncpa [#allocation5], 0  ;;  %s225_s9 = smov [#allocation3]   ;;  %s153_s13 = scalar_lea.hbm %s298_s0, 256 }
   0x3   :  { %s15_s10 = sshll.u32 %s225_s9, 4  ;;  %p154_p0 = scmp.ne.s32.totalorder %s298_s0, %s153_s13  ;;  %s16_s10 = int_to_ptr.vmem [resolvable:$true] %s15_s10 }
   0x4   :  { %p157_p1 = scmp.lt.u32.totalorder %s153_s13, %s298_s0 }
   0x6   :  { %p159_p2 = pnand %p157_p1, %p154_p0 }
   0x8   :  { %162 = shalt.err (!%p159_p2)
}
   0x9   :  { %s163_s18 = scalar_lea.vmem %s16_s10, 256  ;;  %p168_p4 = scmp.lt.s32.totalorder %s16_s10, %s16_s10 }
   0xa   :  { %p164_p3 = scmp.ne.s32.totalorder %s16_s10, %s163_s18  ;;  %p169_p5 = scmp.lt.s32.totalorder %s163_s18, %s163_s18 }
   0xc   :  { %p170_p6 = por %p169_p5, %p168_p4 }
   0xe   :  { %p171_p7 = pnand %p170_p6, %p164_p3 }
  0x10   :  { %174 = shalt.err (!%p171_p7)
}
  0x11   :  { %s226_s19 = smov 128   ;;  %s227_s20 = smov 8  }
  0x12   :  { %21 = dma.hbm_to_vmem [thread:$0]  %s298_s0, 256, %s16_s10, [#allocation4], %s226_s19, %s226_s19, %s227_s20  }
  0x13   :  { %s228_s23 = smov [#allocation6]   ;;  %s175_s27 = scalar_lea.hbm %s299_s1, 512 }
  0x14   :  { %s27_s24 = sshll.u32 %s228_s23, 4  ;;  %p176_p8 = scmp.ne.s32.totalorder %s299_s1, %s175_s27  ;;  %s28_s24 = int_to_ptr.vmem [resolvable:$true] %s27_s24 }
  0x15   :  { %p179_p9 = scmp.lt.u32.totalorder %s175_s27, %s299_s1 }
  0x17   :  { %p181_p10 = pnand %p179_p9, %p176_p8 }
  0x19   :  { %184 = shalt.err (!%p181_p10)
}
  0x1a   :  { %s185_s4 = scalar_lea.vmem %s28_s24, 512  ;;  %p190_p12 = scmp.lt.s32.totalorder %s28_s24, %s28_s24 }
  0x1b   :  { %p186_p11 = scmp.ne.s32.totalorder %s28_s24, %s185_s4  ;;  %p191_p13 = scmp.lt.s32.totalorder %s185_s4, %s185_s4 }
  0x1d   :  { %p192_p0 = por %p191_p13, %p190_p12 }
  0x1f   :  { %p193_p1 = pnand %p192_p0, %p186_p11 }
  0x21   :  { %196 = shalt.err (!%p193_p1)
}
  0x22   :  { %33 = dma.hbm_to_vmem [thread:$0]  %s299_s1, 512, %s28_s24, [#allocation7], %s226_s19, %s226_s19, %s227_s20  }
  0x23   :  { %219 = dma.done.wait [#allocation4], 256  }
  0x24   :  { %220 = vsyncadd [#allocation4], 4294967040 }
  0x25   :  { %221 = dma.done.wait [#allocation7], 512  }
  0x26   :  { %222 = vsyncadd [#allocation7], 4294966784  ;;  %vm45_vm0 = vcmask 785408   ;;  %v229_v0 = vmov 0.0   ;;  %vm230_vm1 = vmmov 0   ;;  %v53_v1 = vld [vmem:[#allocation6] sm:$0xff] }
  0x27   :  { %46 = vst.msk [vmem:[#allocation2] sm:$0xff] %vm45_vm0, %v229_v0  ;;  %47 = vst.msk [vmem:[#allocation2 + $0x8] sm:$0xff] %vm45_vm0, %v229_v0  ;;  %138 = vmatprep.subr.bf16.mxu0 %v229_v0  ;;  %142 = vmatprep.mubr.msk.bf16.mxu0 %vm230_vm1, %v229_v0  ;;  %v54_v2 = vld [vmem:[#allocation6 + $0x8] sm:$0xff]  ;;  %v55_v3 = vld [vmem:[#allocation6 + $0x10] sm:$0xff]  ;;  %vm59_vm2 = vcmask 261120   ;;  %s231_s1 = smov [#allocation8]  }
  0x28   :  { %v57_v4 = vpack.c.bf16 %v54_v2, %v53_v1  ;;  %v56_v5 = vld [vmem:[#allocation6 + $0x18] sm:$0xff]  ;;  %v50_v7 = vld [vmem:[#allocation3] sm:$0xff]  ;;  %s121_s6 = sshll.u32 %s231_s1, 4  ;;  %s122_s6 = int_to_ptr.vmem [resolvable:$true] %s121_s6 }
  0x29   :  { %v58_v6 = vpack.c.bf16 %v56_v5, %v55_v3  ;;  %v51_v8 = vld [vmem:[#allocation3 + $0x8] sm:$0xff]  ;;  %s197_s7 = scalar_lea.vmem %s122_s6, 256  ;;  %p202_p3 = scmp.lt.s32.totalorder %s122_s6, %s122_s6 }
  0x2a   :  { %139 = vmatpush3.bf16.msra.mxu0 %v57_v4  ;;  %v52_v9 = vpack.c.bf16 %v51_v8, %v50_v7  ;;  %p198_p2 = scmp.ne.s32.totalorder %s122_s6, %s197_s7  ;;  %p203_p4 = scmp.lt.s32.totalorder %s197_s7, %s197_s7 }
  0x2b   :  { %140 = vmatprep.subr.bf16.mxu0 %v229_v0 }
  0x2c   :  { %p204_p5 = por %p203_p4, %p202_p3 }
  0x2e   :  { %141 = vmatpush3.bf16.msra.mxu0 %v58_v6  ;;  %v48_v10 = vld [vmem:[#allocation2] sm:$0xff]  ;;  %v49_v12 = vld [vmem:[#allocation2 + $0x8] sm:$0xff]  ;;  %p205_p6 = pnand %p204_p5, %p198_p2 }
  0x31   :  { %143 = vmatmul.mubr.msk.bf16.vlgmr.msra.gmra.mrb[0].mxu0 %vm59_vm2, %v52_v9 }
 0x104   :  { %v97_v11 = vpop.f32.mrb[0].mxu0 }
 0x105   :  { %v104_v13 = vadd.f32 %v97_v11, %v48_v10  ;;  %v144_v14 = vpop.f32.mrb[1].mxu0 }
 0x106   :  { %v100_v15 = vpop.f32.mrb[2].mxu0 }
 0x107   :  { %107 = vst.msk [vmem:[#allocation2] sm:$0xff] %vm45_vm0, %v104_v13  ;;  %v105_v16 = vadd.f32 %v100_v15, %v49_v12  ;;  %v145_v17 = vpop.f32.mrb[3].mxu0 }
 0x109   :  { %108 = vst.msk [vmem:[#allocation2 + $0x8] sm:$0xff] %vm45_vm0, %v105_v16 }
 0x10e   :  { %v112_v18 = vld [vmem:[#allocation2] sm:$0xff] }
 0x10f   :  { %114 = vst.msk [vmem:[#allocation8] sm:$0xff] %vm45_vm0, %v112_v18 }
 0x110   :  { %v113_v19 = vld [vmem:[#allocation2 + $0x8] sm:$0xff] }
 0x111   :  { %115 = vst.msk [vmem:[#allocation8 + $0x8] sm:$0xff] %vm45_vm0, %v113_v19 }
 0x112   :  { %208 = shalt.err (!%p205_p6)
}
 0x113   :  { %s209_s10 = scalar_lea.hbm %s300_s2, 256 }
 0x114   :  { %p210_p7 = scmp.ne.s32.totalorder %s300_s2, %s209_s10  ;;  %p213_p8 = scmp.lt.u32.totalorder %s209_s10, %s300_s2 }
 0x116   :  { %p215_p9 = pnand %p213_p8, %p210_p7 }
 0x118   :  { %218 = shalt.err (!%p215_p9)
}
 0x119   :  { %127 = dma.vmem_to_hbm [thread:$0]  %s122_s6, 256, %s300_s2, [#allocation5], %s226_s19, %s226_s19, %s227_s20  }
 0x11a   :  { %223 = dma.done.wait [#allocation5], 256  }
 0x11b   :  { %224 = vsyncadd [#allocation5], 4294967040 }
 0x11c   :  { %131 = vsyncpa [#allocation4], 1 }
 0x11d   :  { %132 = vsyncpa [#allocation7], 1 }
 0x11e   :  { %133 = vsyncpa [#allocation5], 1 }

</bundles_post_ra>
